<compile_context>
chip_gen: v5e
topology: v5e:2x2
jax: 0.10.0
libtpu: 0.0.40
codegen_flags: <defaults>
</compile_context>

<pallas_src>
import jax
import jax.numpy as jnp
from jax import lax
from jax.experimental import pallas as pl
from jax.experimental.pallas import tpu as pltpu


def _round_up(x, m):
    return ((x + m - 1) // m) * m


def _cdiv(a, b):
    return -(-a // b)


# ---------------------------------------------------------------------------
# Kernels
# ---------------------------------------------------------------------------

def _mlp_kernel_fused(x_ref, w_fc_ref, w_proj_ref, o_ref):
    """Single hidden slice: whole MLP for one (tm, dim) row tile, no accumulator."""
    x = x_ref[...]
    # c_fc: (tm, dim) . (hidden, dim)^T -> (tm, hidden); contract trailing axes on the MXU.
    w_fc = w_fc_ref[...].astype(x.dtype)          # CastedLinear: weight.to(x.dtype)
    h = lax.dot_general(x, w_fc, (((1,), (1,)), ((), ())),
                        preferred_element_type=jnp.float32)
    h = jnp.maximum(h, 0.0)
    h = (h * h).astype(x.dtype)                   # relu(x)^2, back to activation dtype
    # c_proj: (tm, hidden) . (dim, hidden)^T -> (tm, dim).
    w_pr = w_proj_ref[...].astype(x.dtype)
    out = lax.dot_general(h, w_pr, (((1,), (1,)), ((), ())),
                          preferred_element_type=jnp.float32)
    o_ref[...] = out.astype(o_ref.dtype)


def _mlp_kernel_acc(x_ref, w_fc_ref, w_proj_ref, o_ref, acc_ref):
    """Hidden axis tiled: one (tm, dim) row tile x one tk-wide hidden slice.

    relu^2 is elementwise per hidden column, so accumulating the second matmul per
    hidden slice in f32 is exact.
    """
    k = pl.program_id(1)
    last = pl.num_programs(1) - 1

    x = x_ref[...]
    w_fc = w_fc_ref[...].astype(x.dtype)          # (tk, dim) slice, PyTorch layout
    h = lax.dot_general(x, w_fc, (((1,), (1,)), ((), ())),
                        preferred_element_type=jnp.float32)   # (tm, tk)
    h = jnp.maximum(h, 0.0)
    h = (h * h).astype(x.dtype)
    w_pr = w_proj_ref[...].astype(x.dtype)        # (dim, tk) slice
    partial = lax.dot_general(h, w_pr, (((1,), (1,)), ((), ())),
                              preferred_element_type=jnp.float32)  # (tm, dim)

    @pl.when(k == 0)
    def _():
        acc_ref[...] = jnp.zeros_like(acc_ref)

    total = acc_ref[...] + partial

    @pl.when(k != last)
    def _():
        acc_ref[...] = total

    @pl.when(k == last)          # write result directly; no extra acc write + readback
    def _():
        o_ref[...] = total.astype(o_ref.dtype)


# ---------------------------------------------------------------------------
# Tile selection
# ---------------------------------------------------------------------------

def _pick_tk(hidden):
    """Hidden-axis slice: <=512, a multiple of 128 dividing hidden; else the full hidden."""
    if hidden <= 512:
        return hidden
    for cand in (512, 384, 256, 128):
        if hidden % cand == 0:
            return cand
    return hidden


def _vmem_estimate(tm, tk, dim, isz, w_isz):
    return (2 * tm * dim * isz        # x tile, double-buffered
            + 2 * tm * dim * isz      # out tile, double-buffered
            + 2 * tk * dim * w_isz    # w_fc slice, double-buffered
            + 2 * dim * tk * w_isz    # w_proj slice, double-buffered
            + tm * dim * 4            # f32 accumulator scratch
            + tm * tk * 4)            # f32 intermediate h staged in internal scratch


def _choose_tm(N, dim, tk, isz, w_isz, min_rows, budget):
    n_aligned = _round_up(N, min_rows)
    tm = min(2048, n_aligned)
    if tm >= 256:
        tm = (tm // 256) * 256        # keep MXU-friendly (256-aligned) when large
    tm = max(tm, min_rows)
    while tm > 256 and _vmem_estimate(tm, tk, dim, isz, w_isz) > budget:
        tm -= 256
    while tm > min_rows and _vmem_estimate(tm, tk, dim, isz, w_isz) > budget:
        tm = _round_up(max(min_rows, tm // 2), min_rows)
    # Keep >= 2 row tiles when there is enough work so v7x's two TensorCores both get a share.
    if n_aligned > 256 and tm >= 512 and _cdiv(n_aligned, tm) == 1:
        tm = _round_up(_cdiv(n_aligned, 2), 256)
    return tm


# ---------------------------------------------------------------------------
# Wrapper
# ---------------------------------------------------------------------------

def mlp_forward(x, w_fc, w_proj, *, tm=None, tk=None):
    """x: (..., dim). w_fc: (4*dim, dim), w_proj: (dim, 4*dim) (PyTorch Linear layouts)."""
    dim = x.shape[-1]
    lead_shape = x.shape[:-1]
    hidden = w_fc.shape[0]
    assert w_fc.shape == (hidden, dim)
    assert w_proj.shape == (dim, hidden)

    x2d = x.reshape(-1, dim)
    N = x2d.shape[0]
    isz = jnp.dtype(x.dtype).itemsize
    w_isz = jnp.dtype(w_fc.dtype).itemsize
    min_rows = max(8, 32 // isz)     # 8 for f32, 16 for bf16, 32 for int8

    # Generation-aware VMEM budget: ~80% of physical, capped at 100 MiB
    # (-> ~51 MiB on v7x's 64 MiB, 100 MiB on v5e/v6e's 128 MiB).
    try:
        vmem_cap = int(pltpu.get_tpu_info().vmem_capacity_bytes)
    except Exception:
        vmem_cap = 64 * 1024 * 1024
    vmem_limit = max(32 * 1024 * 1024, min(int(0.8 * vmem_cap), 100 * 1024 * 1024))
    budget = int(vmem_limit * 0.9)

    if tk is None:
        tk = _pick_tk(hidden)
    assert tk == hidden or (hidden % tk == 0 and tk % 128 == 0), \
        "tk must divide hidden and be a multiple of 128 (or equal hidden)"

    if tm is None:
        tm = _choose_tm(N, dim, tk, isz, w_isz, min_rows, budget)
    tm = max(min_rows, min(tm, _round_up(N, min_rows)))
    tm = _round_up(tm, min_rows)

    n_pad = _round_up(N, tm)
    if n_pad != N:
        x2d = jnp.pad(x2d, ((0, n_pad - N), (0, 0)))

    tiles_i = n_pad // tm
    k_steps = 1 if tk == hidden else hidden // tk

    # Weights are re-streamed once per row tile (index_map keyed only on k).
    cost = pl.CostEstimate(
        flops=4 * n_pad * dim * hidden,               # two matmuls
        transcendentals=0,
        bytes_accessed=(2 * n_pad * dim * isz         # x in + out
                        + tiles_i * 2 * dim * hidden * w_isz),
    )

    out_shape = jax.ShapeDtypeStruct((n_pad, dim), x.dtype)

    if k_steps == 1:
        # Fast path: whole hidden dim in one slice; 1-D grid, no accumulator scratch.
        out2d = pl.pallas_call(
            _mlp_kernel_fused,
            out_shape=out_shape,
            grid_spec=pltpu.PrefetchScalarGridSpec(
                num_scalar_prefetch=0,
                grid=(tiles_i,),
                in_specs=[
                    pl.BlockSpec((tm, dim), lambda i: (i, 0)),
                    pl.BlockSpec((hidden, dim), lambda i: (0, 0)),
                    pl.BlockSpec((dim, hidden), lambda i: (0, 0)),
                ],
                out_specs=pl.BlockSpec((tm, dim), lambda i: (i, 0)),
            ),
            compiler_params=pltpu.CompilerParams(
                dimension_semantics=("parallel",),
                vmem_limit_bytes=vmem_limit),
            cost_estimate=cost,
        )(x2d, w_fc, w_proj)
    else:
        out2d = pl.pallas_call(
            _mlp_kernel_acc,
            out_shape=out_shape,
            grid_spec=pltpu.PrefetchScalarGridSpec(
                num_scalar_prefetch=0,
                grid=(tiles_i, k_steps),
                in_specs=[
                    pl.BlockSpec((tm, dim), lambda i, k: (i, 0)),   # x row tile (held across k)
                    pl.BlockSpec((tk, dim), lambda i, k: (k, 0)),   # w_fc hidden slice
                    pl.BlockSpec((dim, tk), lambda i, k: (0, k)),   # w_proj hidden slice
                ],
                out_specs=pl.BlockSpec((tm, dim), lambda i, k: (i, 0)),
                scratch_shapes=[pltpu.VMEM((tm, dim), jnp.float32)],
            ),
            compiler_params=pltpu.CompilerParams(
                dimension_semantics=("parallel", "arbitrary"),
                vmem_limit_bytes=vmem_limit),
            cost_estimate=cost,
        )(x2d, w_fc, w_proj)

    return out2d[:N].reshape(*lead_shape, dim)


# ---------------------------------------------------------------------------
# Self-test
# ---------------------------------------------------------------------------

if __name__ == "__main__":
    # Small shapes consistent with the module: dim=128 -> hidden=512, batch=2, seq=8.
    B, T, dim = 2, 8, 128
    hidden = 4 * dim

    key = jax.random.PRNGKey(0)
    kx, kfc, kproj = jax.random.split(key, 3)

    # Activations in bf16 (recommended for the MXU); weights in f32 (PyTorch master layout),
    # cast in-kernel per CastedLinear semantics.
    x = jax.random.normal(kx, (B, T, dim), dtype=jnp.float32).astype(jnp.bfloat16)

    bound_fc = 1.0 / (dim ** 0.5)
    w_fc = jax.random.uniform(kfc, (hidden, dim), dtype=jnp.float32,
                              minval=-bound_fc, maxval=bound_fc)
    bound_pr = 1.0 / (hidden ** 0.5)
    w_proj = jax.random.uniform(kproj, (dim, hidden), dtype=jnp.float32,
                                minval=-bound_pr, maxval=bound_pr)

    # Reference with the same dtype pipeline (cast weights, f32 accumulation, bf16 activations).
    def ref_mlp(x, w_fc, w_proj):
        x2d = x.reshape(-1, x.shape[-1])
        wfc_c = w_fc.astype(x.dtype)
        wpr_c = w_proj.astype(x.dtype)
        h = lax.dot_general(x2d, wfc_c, (((1,), (1,)), ((), ())),
                            preferred_element_type=jnp.float32)
        h = (jnp.maximum(h, 0.0) ** 2).astype(x.dtype)
        o = lax.dot_general(h, wpr_c, (((1,), (1,)), ((), ())),
                            preferred_element_type=jnp.float32)
        return o.astype(x.dtype).reshape(x.shape)

    ref = ref_mlp(x, w_fc, w_proj)

    # 1) Auto-tiled path (hidden fits in one slice -> fused fast path).
    out_fast = mlp_forward(x, w_fc, w_proj)
    jax.block_until_ready(out_fast)
    assert out_fast.shape == (B, T, dim)
    assert jnp.allclose(out_fast.astype(jnp.float32), ref.astype(jnp.float32),
                        atol=2e-2, rtol=2e-2), "fast-path mismatch vs reference"

    # 2) Force hidden-axis tiling (tk=256 -> 2 k-steps) to exercise the accumulator path.
    out_acc = mlp_forward(x, w_fc, w_proj, tk=256)
    jax.block_until_ready(out_acc)
    assert jnp.allclose(out_acc.astype(jnp.float32), ref.astype(jnp.float32),
                        atol=2e-2, rtol=2e-2), "accumulator-path mismatch vs reference"

    # 3) Module's actual init zeroes c_proj.weight -> output must be exactly zero.
    out0 = mlp_forward(x, w_fc, jnp.zeros_like(w_proj))
    jax.block_until_ready(out0)
    assert jnp.all(out0 == 0), "zero-init c_proj must give exactly zero output"

    print("KERNEL_OK")
</pallas_src>

<mosaic_0001>
module attributes {stable_mosaic.version = 11 : i64} {
  func.func @_mlp_kernel_fused(%arg0: i32, %arg1: memref<16x128xbf16, #tpu.memory_space<vmem>>, %arg2: memref<512x128xf32, #tpu.memory_space<vmem>>, %arg3: memref<128x512xf32, #tpu.memory_space<vmem>>, %arg4: memref<16x128xbf16, #tpu.memory_space<vmem>>) attributes {dimension_semantics = [#tpu.dimension_semantics<parallel>], iteration_bounds = array<i64: 1>, scalar_prefetch = 0 : i64, scratch_operands = 0 : i64, tpu.core_type = #tpu.core_type<tc>, window_params = [{transform_indices = @transform_0, window_bounds = array<i64: 16, 128>}, {pipeline_mode = #tpu.pipeline_mode<synchronous>, transform_indices = @transform_1, window_bounds = array<i64: 512, 128>}, {pipeline_mode = #tpu.pipeline_mode<synchronous>, transform_indices = @transform_2, window_bounds = array<i64: 128, 512>}, {transform_indices = @transform_3, window_bounds = array<i64: 16, 128>}]} {
    %c0 = arith.constant 0 : index
    %c0_0 = arith.constant 0 : index
    %0 = vector.load %arg1[%c0, %c0_0] : memref<16x128xbf16, #tpu.memory_space<vmem>>, vector<16x128xbf16>
    %c0_1 = arith.constant 0 : index
    %c0_2 = arith.constant 0 : index
    %1 = vector.load %arg2[%c0_1, %c0_2] : memref<512x128xf32, #tpu.memory_space<vmem>>, vector<512x128xf32>
    %2 = arith.truncf %1 : vector<512x128xf32> to vector<512x128xbf16>
    %cst = arith.constant dense<0.000000e+00> : vector<16x512xf32>
    %3 = tpu.matmul %0, %2, %cst {dimension_numbers = #tpu.dot_dimension_numbers<[1], [1], [0], [0], [0, 0, 1, 0], [], []>} : vector<16x128xbf16>, vector<512x128xbf16>, vector<16x512xf32> -> vector<16x512xf32>
    %cst_3 = arith.constant 0.000000e+00 : f32
    %4 = vector.broadcast %cst_3 : f32 to vector<16x512xf32>
    %5 = arith.maximumf %3, %4 : vector<16x512xf32>
    %6 = arith.mulf %5, %5 : vector<16x512xf32>
    %7 = arith.truncf %6 : vector<16x512xf32> to vector<16x512xbf16>
    %c0_4 = arith.constant 0 : index
    %c0_5 = arith.constant 0 : index
    %8 = vector.load %arg3[%c0_4, %c0_5] : memref<128x512xf32, #tpu.memory_space<vmem>>, vector<128x512xf32>
    %9 = arith.truncf %8 : vector<128x512xf32> to vector<128x512xbf16>
    %cst_6 = arith.constant dense<0.000000e+00> : vector<16x128xf32>
    %10 = tpu.matmul %7, %9, %cst_6 {dimension_numbers = #tpu.dot_dimension_numbers<[1], [1], [0], [0], [0, 0, 1, 0], [], []>} : vector<16x512xbf16>, vector<128x512xbf16>, vector<16x128xf32> -> vector<16x128xf32>
    %11 = arith.truncf %10 : vector<16x128xf32> to vector<16x128xbf16>
    %c0_7 = arith.constant 0 : index
    %c0_8 = arith.constant 0 : index
    %12 = vector.load %arg4[%c0_7, %c0_8] : memref<16x128xbf16, #tpu.memory_space<vmem>>, vector<16x128xbf16>
    tpu.vector_store %arg4[%c0_7, %c0_8], %11 {strides = array<i32>} : memref<16x128xbf16, #tpu.memory_space<vmem>>, vector<16x128xbf16>,
    return
  }
  func.func @transform_0(%arg0: i32) -> (i32, i32) {
    %c0_i32 = arith.constant 0 : i32
    %c0_i32_0 = arith.constant 0 : i32
    return %arg0, %c0_i32 : i32, i32
  }
  func.func @transform_1(%arg0: i32) -> (i32, i32) {
    %c0_i32 = arith.constant 0 : i32
    %c0_i32_0 = arith.constant 0 : i32
    %c0_i32_1 = arith.constant 0 : i32
    return %c0_i32, %c0_i32_0 : i32, i32
  }
  func.func @transform_2(%arg0: i32) -> (i32, i32) {
    %c0_i32 = arith.constant 0 : i32
    %c0_i32_0 = arith.constant 0 : i32
    %c0_i32_1 = arith.constant 0 : i32
    return %c0_i32, %c0_i32_0 : i32, i32
  }
  func.func @transform_3(%arg0: i32) -> (i32, i32) {
    %c0_i32 = arith.constant 0 : i32
    %c0_i32_0 = arith.constant 0 : i32
    return %arg0, %c0_i32 : i32, i32
  }
}

</mosaic_0001>

<bundles_post_ra>
// kernel: tpu_custom_call.1
= control target key start
LH: loop header
LB: loop body
LE: loop exit
PB: predicated region body
PF: predicated region fallthrough
CT: control target
= control target key end

     0   :  { %8 = vsyncpa [#allocation3], 0  ;;  %s588_s0 = inlined_call_operand.hbm [shape: bf16[16,128], index: 0, kind: input, shape index: {}]   ;;  %s589_s1 = inlined_call_operand.hbm [shape: f32[512,128], index: 1, kind: input, shape index: {}]   ;;  %s590_s2 = inlined_call_operand.hbm [shape: f32[128,512], index: 2, kind: input, shape index: {}]   ;;  %s591_s3 = inlined_call_operand.hbm [shape: bf16[16,128], index: 3, kind: output, shape index: {}]  }
   0x1   :  { %9 = vsyncpa [#allocation6], 0  ;;  %s28_s14 = sshll.u32 %s589_s1, 4  ;;  %s29_s14 = int_to_ptr.hbm [resolvable:$true] %s28_s14 }
   0x2   :  { %10 = vsyncpa [#allocation4], 0  ;;  %s540_s15 = smov [#allocation5]   ;;  %s15_s19 = sshll.u32 %s588_s0, 4  ;;  %s16_s19 = int_to_ptr.hbm [resolvable:$true] %s15_s19 }
   0x3   :  { %s30_s16 = sshll.u32 %s540_s15, 4  ;;  %s541_s20 = smov 128   ;;  %s31_s16 = int_to_ptr.vmem [resolvable:$true] %s30_s16 }
   0x4   :  { %s542_s21 = smov 8   ;;  %s543_s22 = smov [#allocation2]  }
   0x5   :  { %36 = dma.hbm_to_vmem [thread:$0]  %s29_s14, 8192, %s31_s16, [#allocation6], %s541_s20, %s541_s20, %s542_s21  }
   0x6   :  { %s17_s23 = sshll.u32 %s543_s22, 4  ;;  %s544_s24 = smov 64   ;;  %s18_s23 = int_to_ptr.vmem [resolvable:$true] %s17_s23 }
   0x7   :  { %s545_s25 = smov 4   ;;  %s41_s27 = sshll.u32 %s590_s2, 4  ;;  %s42_s27 = int_to_ptr.hbm [resolvable:$true] %s41_s27 }
   0x8   :  { %23 = dma.hbm_to_vmem [thread:$0]  %s16_s19, 128, %s18_s23, [#allocation3], %s544_s24, %s544_s24, %s545_s25  }
   0x9   :  { %s546_s28 = smov [#allocation7]   ;;  %s547_s29 = smov 512  }
   0xa   :  { %s43_s0 = sshll.u32 %s546_s28, 4  ;;  %s548_s30 = smov 32   ;;  %s44_s0 = int_to_ptr.vmem [resolvable:$true] %s43_s0 }
   0xb   :  { %49 = dma.hbm_to_vmem [thread:$0]  %s42_s27, 8192, %s44_s0, [#allocation6], %s547_s29, %s547_s29, %s548_s30  }
   0xc   :  { %534 = dma.done.wait [#allocation3], 128  }
   0xd   :  { %535 = vsyncadd [#allocation3], 4294967168 }
   0xe   :  { %536 = dma.done.wait [#allocation6], 16384  }
   0xf   :  { %537 = vsyncadd [#allocation6], 4294950912  ;;  %v78_v0 = vld [vmem:[#allocation5 + $0x70] sm:$0xff]  ;;  %v79_v1 = vld [vmem:[#allocation5 + $0x78] sm:$0xff]  ;;  %s549_s2 = smov [#allocation8]   ;;  %s404_s7 = sshll.u32 %s591_s3, 4  ;;  %s405_s7 = int_to_ptr.hbm [resolvable:$true] %s404_s7 }
  0x10   :  { %v94_v2 = vld [vmem:[#allocation5 + $0xf0] sm:$0xff]  ;;  %v135_v3 = vpack.c.bf16 %v79_v1, %v78_v0  ;;  %v95_v4 = vld [vmem:[#allocation5 + $0xf8] sm:$0xff]  ;;  %v76_v12 = vld [vmem:[#allocation5 + $0x60] sm:$0xff]  ;;  %s402_s4 = sshll.u32 %s549_s2, 4  ;;  %s403_s4 = int_to_ptr.vmem [resolvable:$true] %s402_s4 }
  0x11   :  { %v110_v5 = vld [vmem:[#allocation5 + $0x170] sm:$0xff]  ;;  %v111_v6 = vld [vmem:[#allocation5 + $0x178] sm:$0xff]  ;;  %v143_v7 = vpack.c.bf16 %v95_v4, %v94_v2  ;;  %v77_v13 = vld [vmem:[#allocation5 + $0x68] sm:$0xff] }
  0x12   :  { %v151_v8 = vpack.c.bf16 %v111_v6, %v110_v5  ;;  %v126_v9 = vld [vmem:[#allocation5 + $0x1f0] sm:$0xff]  ;;  %v127_v10 = vld [vmem:[#allocation5 + $0x1f8] sm:$0xff]  ;;  %166 = vmatpush.bf16.xpose.msra.mxu0 %v135_v3  ;;  %v92_v14 = vld [vmem:[#allocation5 + $0xe0] sm:$0xff]  ;;  %v134_v20 = vpack.c.bf16 %v77_v13, %v76_v12 }
  0x13   :  { %v159_v11 = vpack.c.bf16 %v127_v10, %v126_v9  ;;  %180 = vmatpush.bf16.xpose.msra.mxu1 %v143_v7  ;;  %v93_v15 = vld [vmem:[#allocation5 + $0xe8] sm:$0xff]  ;;  %v108_v16 = vld [vmem:[#allocation5 + $0x160] sm:$0xff]  ;;  %v74_v24 = vld [vmem:[#allocation5 + $0x50] sm:$0xff] }
  0x14   :  { %194 = vmatpush.bf16.xpose.msra.mxu2 %v151_v8  ;;  %v109_v17 = vld [vmem:[#allocation5 + $0x168] sm:$0xff]  ;;  %v124_v18 = vld [vmem:[#allocation5 + $0x1e0] sm:$0xff]  ;;  %v142_v21 = vpack.c.bf16 %v93_v15, %v92_v14  ;;  %v75_v25 = vld [vmem:[#allocation5 + $0x58] sm:$0xff] }
  0x15   :  { %208 = vmatpush.bf16.xpose.msra.mxu3 %v159_v11  ;;  %v125_v19 = vld [vmem:[#allocation5 + $0x1e8] sm:$0xff]  ;;  %v150_v22 = vpack.c.bf16 %v109_v17, %v108_v16  ;;  %v90_v26 = vld [vmem:[#allocation5 + $0xd0] sm:$0xff]  ;;  %v91_v27 = vld [vmem:[#allocation5 + $0xd8] sm:$0xff]  ;;  %v133_v32 = vpack.c.bf16 %v75_v25, %v74_v24 }
  0x16   :  { %v158_v23 = vpack.c.bf16 %v125_v19, %v124_v18  ;;  %v106_v28 = vld [vmem:[#allocation5 + $0x150] sm:$0xff]  ;;  %v107_v29 = vld [vmem:[#allocation5 + $0x158] sm:$0xff]  ;;  %v141_v33 = vpack.c.bf16 %v91_v27, %v90_v26  ;;  %v72_v36 = vld [vmem:[#allocation5 + $0x40] sm:$0xff] }
  0x17   :  { %v122_v30 = vld [vmem:[#allocation5 + $0x1d0] sm:$0xff]  ;;  %v123_v31 = vld [vmem:[#allocation5 + $0x1d8] sm:$0xff]  ;;  %v149_v34 = vpack.c.bf16 %v107_v29, %v106_v28  ;;  %v73_v37 = vld [vmem:[#allocation5 + $0x48] sm:$0xff] }
  0x18   :  { %v157_v35 = vpack.c.bf16 %v123_v31, %v122_v30  ;;  %v88_v38 = vld [vmem:[#allocation5 + $0xc0] sm:$0xff]  ;;  %v89_v39 = vld [vmem:[#allocation5 + $0xc8] sm:$0xff]  ;;  %v132_v44 = vpack.c.bf16 %v73_v37, %v72_v36  ;;  %v70_v48 = vld [vmem:[#allocation5 + $0x30] sm:$0xff] }
  0x19   :  { %v104_v40 = vld [vmem:[#allocation5 + $0x140] sm:$0xff]  ;;  %v105_v41 = vld [vmem:[#allocation5 + $0x148] sm:$0xff]  ;;  %v140_v45 = vpack.c.bf16 %v89_v39, %v88_v38  ;;  %v71_v49 = vld [vmem:[#allocation5 + $0x38] sm:$0xff] }
  0x1a   :  { %167 = vmatpush.bf16.xpose.msra.mxu0 %v134_v20  ;;  %v120_v42 = vld [vmem:[#allocation5 + $0x1c0] sm:$0xff]  ;;  %v121_v43 = vld [vmem:[#allocation5 + $0x1c8] sm:$0xff]  ;;  %v148_v46 = vpack.c.bf16 %v105_v41, %v104_v40  ;;  %v86_v50 = vld [vmem:[#allocation5 + $0xb0] sm:$0xff]  ;;  %v131_v56 = vpack.c.bf16 %v71_v49, %v70_v48 }
  0x1b   :  { %181 = vmatpush.bf16.xpose.msra.mxu1 %v142_v21  ;;  %v156_v47 = vpack.c.bf16 %v121_v43, %v120_v42  ;;  %v87_v51 = vld [vmem:[#allocation5 + $0xb8] sm:$0xff]  ;;  %v102_v52 = vld [vmem:[#allocation5 + $0x130] sm:$0xff]  ;;  %v68_v60 = vld [vmem:[#allocation5 + $0x20] sm:$0xff] }
  0x1c   :  { %195 = vmatpush.bf16.xpose.msra.mxu2 %v150_v22  ;;  %v103_v53 = vld [vmem:[#allocation5 + $0x138] sm:$0xff]  ;;  %v118_v54 = vld [vmem:[#allocation5 + $0x1b0] sm:$0xff]  ;;  %v139_v57 = vpack.c.bf16 %v87_v51, %v86_v50  ;;  %v69_v61 = vld [vmem:[#allocation5 + $0x28] sm:$0xff] }
  0x1d   :  { %209 = vmatpush.bf16.xpose.msra.mxu3 %v158_v23  ;;  %v119_v55 = vld [vmem:[#allocation5 + $0x1b8] sm:$0xff]  ;;  %v147_v58 = vpack.c.bf16 %v103_v53, %v102_v52  ;;  %v84_v62 = vld [vmem:[#allocation5 + $0xa0] sm:$0xff]  ;;  %v85_v63 = vld [vmem:[#allocation5 + $0xa8] sm:$0xff]  ;;  %v130_v4 = vpack.c.bf16 %v69_v61, %v68_v60 }
  0x1e   :  { %v155_v59 = vpack.c.bf16 %v119_v55, %v118_v54  ;;  %v100_v0 = vld [vmem:[#allocation5 + $0x120] sm:$0xff]  ;;  %v101_v1 = vld [vmem:[#allocation5 + $0x128] sm:$0xff]  ;;  %v138_v5 = vpack.c.bf16 %v85_v63, %v84_v62  ;;  %v66_v8 = vld [vmem:[#allocation5 + $0x10] sm:$0xff] }
  0x1f   :  { %v116_v2 = vld [vmem:[#allocation5 + $0x1a0] sm:$0xff]  ;;  %v117_v3 = vld [vmem:[#allocation5 + $0x1a8] sm:$0xff]  ;;  %v146_v6 = vpack.c.bf16 %v101_v1, %v100_v0  ;;  %v67_v9 = vld [vmem:[#allocation5 + $0x18] sm:$0xff] }
  0x20   :  { %v154_v7 = vpack.c.bf16 %v117_v3, %v116_v2  ;;  %v82_v10 = vld [vmem:[#allocation5 + $0x90] sm:$0xff]  ;;  %v83_v11 = vld [vmem:[#allocation5 + $0x98] sm:$0xff]  ;;  %v129_v16 = vpack.c.bf16 %v67_v9, %v66_v8  ;;  %v64_v20 = vld [vmem:[#allocation5] sm:$0xff] }
  0x21   :  { %v98_v12 = vld [vmem:[#allocation5 + $0x110] sm:$0xff]  ;;  %v99_v13 = vld [vmem:[#allocation5 + $0x118] sm:$0xff]  ;;  %v137_v17 = vpack.c.bf16 %v83_v11, %v82_v10  ;;  %v65_v21 = vld [vmem:[#allocation5 + $0x8] sm:$0xff] }
  0x22   :  { %168 = vmatpush.bf16.xpose.msra.mxu0 %v133_v32  ;;  %v114_v14 = vld [vmem:[#allocation5 + $0x190] sm:$0xff]  ;;  %v115_v15 = vld [vmem:[#allocation5 + $0x198] sm:$0xff]  ;;  %v145_v18 = vpack.c.bf16 %v99_v13, %v98_v12  ;;  %v80_v22 = vld [vmem:[#allocation5 + $0x80] sm:$0xff]  ;;  %v128_v31 = vpack.c.bf16 %v65_v21, %v64_v20 }
  0x23   :  { %182 = vmatpush.bf16.xpose.msra.mxu1 %v141_v33  ;;  %v153_v19 = vpack.c.bf16 %v115_v15, %v114_v14  ;;  %v81_v23 = vld [vmem:[#allocation5 + $0x88] sm:$0xff]  ;;  %v96_v24 = vld [vmem:[#allocation5 + $0x100] sm:$0xff]  ;;  %v300_v33 = vld [vmem:[#allocation7 + $0x1d0] sm:$0xff] }
  0x24   :  { %196 = vmatpush.bf16.xpose.msra.mxu2 %v149_v34  ;;  %v97_v25 = vld [vmem:[#allocation5 + $0x108] sm:$0xff]  ;;  %v112_v26 = vld [vmem:[#allocation5 + $0x180] sm:$0xff]  ;;  %v304_v34 = vld [vmem:[#allocation7 + $0x1f0] sm:$0xff] }
  0x25   :  { %210 = vmatpush.bf16.xpose.msra.mxu3 %v157_v35  ;;  %v113_v27 = vld [vmem:[#allocation5 + $0x188] sm:$0xff]  ;;  %v298_v28 = vld [vmem:[#allocation7 + $0x1c0] sm:$0xff]  ;;  %v136_v35 = vpack.c.bf16 %v81_v23, %v80_v22  ;;  %v144_v36 = vpack.c.bf16 %v97_v25, %v96_v24  ;;  %v301_v37 = vld [vmem:[#allocation7 + $0x1d8] sm:$0xff]  ;;  %v336_v42 = vpack.c.bf16 %v304_v34, %v300_v33 }
  0x26   :  { %v302_v29 = vld [vmem:[#allocation7 + $0x1e0] sm:$0xff]  ;;  %v299_v30 = vld [vmem:[#allocation7 + $0x1c8] sm:$0xff]  ;;  %v305_v38 = vld [vmem:[#allocation7 + $0x1f8] sm:$0xff]  ;;  %v152_v39 = vpack.c.bf16 %v113_v27, %v112_v26 }
  0x27   :  { %v303_v32 = vld [vmem:[#allocation7 + $0x1e8] sm:$0xff]  ;;  %v334_v40 = vpack.c.bf16 %v302_v29, %v298_v28  ;;  %v337_v43 = vpack.c.bf16 %v305_v38, %v301_v37  ;;  %v292_v49 = vld [vmem:[#allocation7 + $0x190] sm:$0xff]  ;;  %v293_v51 = vld [vmem:[#allocation7 + $0x198] sm:$0xff] }
  0x28   :  { %v335_v41 = vpack.c.bf16 %v303_v32, %v299_v30  ;;  %v295_v48 = vld [vmem:[#allocation7 + $0x1a8] sm:$0xff]  ;;  %v296_v50 = vld [vmem:[#allocation7 + $0x1b0] sm:$0xff]  ;;  %v297_v52 = vld [vmem:[#allocation7 + $0x1b8] sm:$0xff] }
  0x29   :  { %v332_v55 = vpack.c.bf16 %v296_v50, %v292_v49  ;;  %v287_v60 = vld [vmem:[#allocation7 + $0x168] sm:$0xff]  ;;  %v284_v61 = vld [vmem:[#allocation7 + $0x150] sm:$0xff]  ;;  %v285_v63 = vld [vmem:[#allocation7 + $0x158] sm:$0xff] }
  0x2a   :  { %169 = vmatpush.bf16.xpose.msra.mxu0 %v132_v44  ;;  %v422_v44 = vld [vmem:[#allocation2] sm:$0xff]  ;;  %v288_v62 = vld [vmem:[#allocation7 + $0x170] sm:$0xff]  ;;  %v279_v8 = vld [vmem:[#allocation7 + $0x128] sm:$0xff] }
  0x2b   :  { %183 = vmatpush.bf16.xpose.msra.mxu1 %v140_v45  ;;  %v290_v45 = vld [vmem:[#allocation7 + $0x180] sm:$0xff]  ;;  %v289_v0 = vld [vmem:[#allocation7 + $0x178] sm:$0xff]  ;;  %v328_v3 = vpack.c.bf16 %v288_v62, %v284_v61  ;;  %v276_v9 = vld [vmem:[#allocation7 + $0x110] sm:$0xff] }
  0x2c   :  { %197 = vmatpush.bf16.xpose.msra.mxu2 %v148_v46  ;;  %v294_v46 = vld [vmem:[#allocation7 + $0x1a0] sm:$0xff]  ;;  %v280_v10 = vld [vmem:[#allocation7 + $0x130] sm:$0xff]  ;;  %v277_v11 = vld [vmem:[#allocation7 + $0x118] sm:$0xff] }
  0x2d   :  { %211 = vmatpush.bf16.xpose.msra.mxu3 %v156_v47  ;;  %v291_v47 = vld [vmem:[#allocation7 + $0x188] sm:$0xff]  ;;  %v330_v53 = vpack.c.bf16 %v294_v46, %v290_v45  ;;  %v281_v12 = vld [vmem:[#allocation7 + $0x138] sm:$0xff]  ;;  %v324_v15 = vpack.c.bf16 %v280_v10, %v276_v9  ;;  %v268_v21 = vld [vmem:[#allocation7 + $0xd0] sm:$0xff] }
  0x2e   :  { %v331_v54 = vpack.c.bf16 %v295_v48, %v291_v47  ;;  %v271_v20 = vld [vmem:[#allocation7 + $0xe8] sm:$0xff]  ;;  %v272_v22 = vld [vmem:[#allocation7 + $0xf0] sm:$0xff]  ;;  %v269_v23 = vld [vmem:[#allocation7 + $0xd8] sm:$0xff] }
  0x2f   :  { %v273_v24 = vld [vmem:[#allocation7 + $0xf8] sm:$0xff]  ;;  %v320_v27 = vpack.c.bf16 %v272_v22, %v268_v21  ;;  %v258_v29 = vld [vmem:[#allocation7 + $0x80] sm:$0xff]  ;;  %v263_v32 = vld [vmem:[#allocation7 + $0xa8] sm:$0xff] }
  0x30   :  { %v321_v28 = vpack.c.bf16 %v273_v24, %v269_v23  ;;  %v262_v30 = vld [vmem:[#allocation7 + $0xa0] sm:$0xff]  ;;  %v260_v33 = vld [vmem:[#allocation7 + $0x90] sm:$0xff]  ;;  %v255_v45 = vld [vmem:[#allocation7 + $0x68] sm:$0xff] }
  0x31   :  { %v264_v34 = vld [vmem:[#allocation7 + $0xb0] sm:$0xff]  ;;  %v314_v37 = vpack.c.bf16 %v262_v30, %v258_v29  ;;  %v253_v49 = vld [vmem:[#allocation7 + $0x58] sm:$0xff] }
  0x32   :  { %170 = vmatpush.bf16.xpose.msra.mxu0 %v131_v56  ;;  %v333_v56 = vpack.c.bf16 %v297_v52, %v293_v51  ;;  %v252_v47 = vld [vmem:[#allocation7 + $0x50] sm:$0xff]  ;;  %v257_v51 = vld [vmem:[#allocation7 + $0x78] sm:$0xff] }
  0x33   :  { %184 = vmatpush.bf16.xpose.msra.mxu1 %v139_v57  ;;  %v282_v57 = vld [vmem:[#allocation7 + $0x140] sm:$0xff]  ;;  %v256_v48 = vld [vmem:[#allocation7 + $0x70] sm:$0xff]  ;;  %v313_v52 = vpack.c.bf16 %v257_v51, %v253_v49  ;;  %v245_v61 = vld [vmem:[#allocation7 + $0x18] sm:$0xff] }
  0x34   :  { %198 = vmatpush.bf16.xpose.msra.mxu2 %v147_v58  ;;  %v286_v58 = vld [vmem:[#allocation7 + $0x160] sm:$0xff]  ;;  %v312_v50 = vpack.c.bf16 %v256_v48, %v252_v47 }
  0x35   :  { %212 = vmatpush.bf16.xpose.msra.mxu3 %v155_v59  ;;  %v283_v59 = vld [vmem:[#allocation7 + $0x148] sm:$0xff]  ;;  %v326_v1 = vpack.c.bf16 %v286_v58, %v282_v57 }
  0x36   :  { %v327_v2 = vpack.c.bf16 %v287_v60, %v283_v59  ;;  %v247_v57 = vld [vmem:[#allocation7 + $0x28] sm:$0xff]  ;;  %v244_v59 = vld [vmem:[#allocation7 + $0x10] sm:$0xff] }
  0x37   :  { %v248_v60 = vld [vmem:[#allocation7 + $0x30] sm:$0xff] }
  0x38   :  { %v308_v62 = vpack.c.bf16 %v248_v60, %v244_v59 }
  0x3a   :  { %171 = vmatpush.bf16.xpose.msra.mxu0 %v130_v4  ;;  %v329_v4 = vpack.c.bf16 %v289_v0, %v285_v63  ;;  %v249_v63 = vld [vmem:[#allocation7 + $0x38] sm:$0xff] }
  0x3b   :  { %185 = vmatpush.bf16.xpose.msra.mxu1 %v138_v5  ;;  %v274_v5 = vld [vmem:[#allocation7 + $0x100] sm:$0xff]  ;;  %v309_v0 = vpack.c.bf16 %v249_v63, %v245_v61 }
  0x3c   :  { %199 = vmatpush.bf16.xpose.msra.mxu2 %v146_v6  ;;  %v278_v6 = vld [vmem:[#allocation7 + $0x120] sm:$0xff] }
  0x3d   :  { %213 = vmatpush.bf16.xpose.msra.mxu3 %v154_v7  ;;  %v275_v7 = vld [vmem:[#allocation7 + $0x108] sm:$0xff]  ;;  %v322_v13 = vpack.c.bf16 %v278_v6, %v274_v5 }
  0x3e   :  { %v323_v14 = vpack.c.bf16 %v279_v8, %v275_v7 }
  0x42   :  { %172 = vmatpush.bf16.xpose.msra.mxu0 %v129_v16  ;;  %v325_v16 = vpack.c.bf16 %v281_v12, %v277_v11 }
  0x43   :  { %186 = vmatpush.bf16.xpose.msra.mxu1 %v137_v17  ;;  %v266_v17 = vld [vmem:[#allocation7 + $0xc0] sm:$0xff] }
  0x44   :  { %200 = vmatpush.bf16.xpose.msra.mxu2 %v145_v18  ;;  %v270_v18 = vld [vmem:[#allocation7 + $0xe0] sm:$0xff] }
  0x45   :  { %214 = vmatpush.bf16.xpose.msra.mxu3 %v153_v19  ;;  %v267_v19 = vld [vmem:[#allocation7 + $0xc8] sm:$0xff]  ;;  %v318_v25 = vpack.c.bf16 %v270_v18, %v266_v17 }
  0x46   :  { %v319_v26 = vpack.c.bf16 %v271_v20, %v267_v19 }
  0x4a   :  { %173 = vmatpush.bf16.xpose.msra.mxu0 %v128_v31  ;;  %v259_v31 = vld [vmem:[#allocation7 + $0x88] sm:$0xff] }
  0x4b   :  { %187 = vmatpush.bf16.xpose.msra.mxu1 %v136_v35  ;;  %v261_v35 = vld [vmem:[#allocation7 + $0x98] sm:$0xff]  ;;  %v315_v38 = vpack.c.bf16 %v263_v32, %v259_v31 }
  0x4c   :  { %201 = vmatpush.bf16.xpose.msra.mxu2 %v144_v36  ;;  %v265_v36 = vld [vmem:[#allocation7 + $0xb8] sm:$0xff] }
  0x4d   :  { %215 = vmatpush.bf16.xpose.msra.mxu3 %v152_v39  ;;  %v316_v39 = vpack.c.bf16 %v264_v34, %v260_v33 }
  0x51   :  { %174 = vmatmul.bf16.vlgmr.msra.gmra.mxu0 %v422_v44 }
  0x52   :  { %338 = vmatpush.bf16.xpose.msrb.mxu0 %v334_v40  ;;  %188 = vmatmul.bf16.vlgmr.msra.gmra.mxu1 %v422_v44  ;;  %v317_v40 = vpack.c.bf16 %v265_v36, %v261_v35 }
  0x53   :  { %352 = vmatpush.bf16.xpose.msrb.mxu1 %v335_v41  ;;  %202 = vmatmul.bf16.vlgmr.msra.gmra.mxu2 %v422_v44  ;;  %v250_v41 = vld [vmem:[#allocation7 + $0x40] sm:$0xff] }
  0x54   :  { %366 = vmatpush.bf16.xpose.msrb.mxu2 %v336_v42  ;;  %216 = vmatmul.bf16.vlgmr.msra.gmra.mxu3 %v422_v44  ;;  %v254_v42 = vld [vmem:[#allocation7 + $0x60] sm:$0xff] }
  0x55   :  { %380 = vmatpush.bf16.xpose.msrb.mxu3 %v337_v43  ;;  %v251_v43 = vld [vmem:[#allocation7 + $0x48] sm:$0xff]  ;;  %v310_v44 = vpack.c.bf16 %v254_v42, %v250_v41 }
  0x56   :  { %v311_v46 = vpack.c.bf16 %v255_v45, %v251_v43 }
  0x5a   :  { %339 = vmatpush.bf16.xpose.msrb.mxu0 %v330_v53  ;;  %v242_v53 = vld [vmem:[#allocation7] sm:$0xff] }
  0x5b   :  { %353 = vmatpush.bf16.xpose.msrb.mxu1 %v331_v54  ;;  %v246_v54 = vld [vmem:[#allocation7 + $0x20] sm:$0xff] }
  0x5c   :  { %367 = vmatpush.bf16.xpose.msrb.mxu2 %v332_v55  ;;  %v243_v55 = vld [vmem:[#allocation7 + $0x8] sm:$0xff] }
  0x5d   :  { %381 = vmatpush.bf16.xpose.msrb.mxu3 %v333_v56  ;;  %v306_v56 = vpack.c.bf16 %v246_v54, %v242_v53  ;;  %v307_v58 = vpack.c.bf16 %v247_v57, %v243_v55 }
  0x62   :  { %340 = vmatpush.bf16.xpose.msrb.mxu0 %v326_v1 }
  0x63   :  { %354 = vmatpush.bf16.xpose.msrb.mxu1 %v327_v2 }
  0x64   :  { %368 = vmatpush.bf16.xpose.msrb.mxu2 %v328_v3 }
  0x65   :  { %382 = vmatpush.bf16.xpose.msrb.mxu3 %v329_v4 }
  0x6a   :  { %341 = vmatpush.bf16.xpose.msrb.mxu0 %v322_v13 }
  0x6b   :  { %355 = vmatpush.bf16.xpose.msrb.mxu1 %v323_v14 }
  0x6c   :  { %369 = vmatpush.bf16.xpose.msrb.mxu2 %v324_v15 }
  0x6d   :  { %383 = vmatpush.bf16.xpose.msrb.mxu3 %v325_v16 }
  0x72   :  { %342 = vmatpush.bf16.xpose.msrb.mxu0 %v318_v25 }
  0x73   :  { %356 = vmatpush.bf16.xpose.msrb.mxu1 %v319_v26 }
  0x74   :  { %370 = vmatpush.bf16.xpose.msrb.mxu2 %v320_v27 }
  0x75   :  { %384 = vmatpush.bf16.xpose.msrb.mxu3 %v321_v28 }
  0x7a   :  { %343 = vmatpush.bf16.xpose.msrb.mxu0 %v314_v37 }
  0x7b   :  { %357 = vmatpush.bf16.xpose.msrb.mxu1 %v315_v38 }
  0x7c   :  { %371 = vmatpush.bf16.xpose.msrb.mxu2 %v316_v39 }
  0x7d   :  { %385 = vmatpush.bf16.xpose.msrb.mxu3 %v317_v40 }
  0x82   :  { %344 = vmatpush.bf16.xpose.msrb.mxu0 %v310_v44 }
  0x83   :  { %358 = vmatpush.bf16.xpose.msrb.mxu1 %v311_v46 }
  0x84   :  { %372 = vmatpush.bf16.xpose.msrb.mxu2 %v312_v50 }
  0x85   :  { %386 = vmatpush.bf16.xpose.msrb.mxu3 %v313_v52 }
  0x8a   :  { %345 = vmatpush.bf16.xpose.msrb.mxu0 %v306_v56 }
  0x8b   :  { %359 = vmatpush.bf16.xpose.msrb.mxu1 %v307_v58 }
  0x8c   :  { %373 = vmatpush.bf16.xpose.msrb.mxu2 %v308_v62 }
  0x8d   :  { %387 = vmatpush.bf16.xpose.msrb.mxu3 %v309_v0 }
  0xce   :  { %v175_v1 = vpop.f32.mrf.mxu0 }
  0xcf   :  { %v189_v2 = vpop.f32.mrf.mxu1  ;;  %v222_v3 = vmax.f32 %v175_v1, 0.0 }
  0xd0   :  { %v223_v4 = vmax.f32 %v189_v2, 0.0 }
  0xd1   :  { %v230_v8 = vmul.f32 %v222_v3, %v222_v3 }
  0xd2   :  { %v231_v11 = vmul.f32 %v223_v4, %v223_v4 }
  0xd6   :  { %v203_v5 = vpop.f32.mrf.mxu2  ;;  %v177_v7 = vpop.f32.mrf.mxu0 }
  0xd7   :  { %v217_v6 = vpop.f32.mrf.mxu3  ;;  %v226_v9 = vmax.f32 %v177_v7, 0.0  ;;  %v191_v10 = vpop.f32.mrf.mxu1  ;;  %v224_v16 = vmax.f32 %v203_v5, 0.0 }
  0xd8   :  { %v227_v12 = vmax.f32 %v191_v10, 0.0  ;;  %v225_v18 = vmax.f32 %v217_v6, 0.0 }
  0xd9   :  { %v234_v13 = vmul.f32 %v226_v9, %v226_v9  ;;  %v232_v23 = vmul.f32 %v224_v16, %v224_v16 }
  0xda   :  { %v235_v14 = vmul.f32 %v227_v12, %v227_v12  ;;  %v233_v25 = vmul.f32 %v225_v18, %v225_v18 }
  0xdb   :  { %v238_v15 = vpack.c.bf16 %v234_v13, %v230_v8 }
  0xdc   :  { %v239_v17 = vpack.c.bf16 %v235_v14, %v231_v11 }
  0xdd   :  { %346 = vmatmul.bf16.vlgmr.msrb.gmra.mxu0 %v238_v15 }
  0xde   :  { %v205_v19 = vpop.f32.mrf.mxu2  ;;  %360 = vmatmul.bf16.vlgmr.msrb.gmra.mxu1 %v239_v17 }
  0xdf   :  { %v228_v20 = vmax.f32 %v205_v19, 0.0  ;;  %v219_v21 = vpop.f32.mrf.mxu3 }
  0xe0   :  { %v229_v22 = vmax.f32 %v219_v21, 0.0 }
  0xe1   :  { %v236_v24 = vmul.f32 %v228_v20, %v228_v20 }
  0xe2   :  { %v237_v26 = vmul.f32 %v229_v22, %v229_v22 }
  0xe3   :  { %v240_v27 = vpack.c.bf16 %v236_v24, %v232_v23 }
  0xe4   :  { %v241_v28 = vpack.c.bf16 %v237_v26, %v233_v25 }
  0xe5   :  { %374 = vmatmul.bf16.vlgmr.msrb.gmra.mxu2 %v240_v27 }
  0xe6   :  { %388 = vmatmul.bf16.vlgmr.msrb.gmra.mxu3 %v241_v28 }
 0x15a   :  { %v347_v29 = vpop.f32.mrf.mxu0 }
 0x15b   :  { %v361_v30 = vpop.f32.mrf.mxu1 }
 0x15c   :  { %v362_v35 = vadd.f32 %v361_v30, %v347_v29 }
 0x162   :  { %v349_v33 = vpop.f32.mrf.mxu0 }
 0x163   :  { %v363_v34 = vpop.f32.mrf.mxu1 }
 0x164   :  { %v364_v36 = vadd.f32 %v363_v34, %v349_v33 }
 0x168   :  { %v375_v31 = vpop.f32.mrf.mxu2 }
 0x169   :  { %v389_v32 = vpop.f32.mrf.mxu3  ;;  %v376_v37 = vadd.f32 %v375_v31, %v362_v35 }
 0x16b   :  { %v390_v41 = vadd.f32 %v389_v32, %v376_v37 }
 0x170   :  { %v377_v38 = vpop.f32.mrf.mxu2 }
 0x171   :  { %v378_v39 = vadd.f32 %v377_v38, %v364_v36  ;;  %v391_v40 = vpop.f32.mrf.mxu3 }
 0x173   :  { %v392_v42 = vadd.f32 %v391_v40, %v378_v39 }
 0x175   :  { %v426_v43 = vpack.c.bf16 %v392_v42, %v390_v41 }
 0x177   :  { %427 = vst [vmem:[#allocation8] sm:$0xff] %v426_v43  }
 0x178   :  { %410 = dma.vmem_to_hbm [thread:$0]  %s403_s4, 128, %s405_s7, [#allocation4], %s544_s24, %s544_s24, %s545_s25  }
 0x179   :  { %538 = dma.done.wait [#allocation4], 128  }
 0x17a   :  { %539 = vsyncadd [#allocation4], 4294967168 }
 0x17b   :  { %415 = vsyncpa [#allocation3], 1 }
 0x17c   :  { %416 = vsyncpa [#allocation6], 1 }
 0x17d   :  { %417 = vsyncpa [#allocation4], 1 }

</bundles_post_ra>
